<compile_context>
chip_gen: v7x
topology: tpu7x:2x2x1
jax: 0.10.0
libtpu: 0.0.40
codegen_flags: <defaults>
</compile_context>

<pallas_src>
import functools

import jax
import jax.numpy as jnp
from jax.experimental import pallas as pl
from jax.experimental.pallas import tpu as pltpu

LANES = 128
TM_MAX = 4096   # rows per grid step -> 2 MiB f32 per input block


def _sublane_granule(dtype):
    # Minimum second-to-last block dim for this dtype's TPU tiling.
    return {4: 8, 2: 16, 1: 32}[jnp.dtype(dtype).itemsize]


def _elementwise_loss(x, y, weight_bce, weight_hinge, fold_equal):
    """Per-element loss in f32.

    If fold_equal, returns (bce + hinge); the caller applies the common weight
    once at finalize.  Otherwise returns the fully weighted per-element loss.
    """
    x = x.astype(jnp.float32)
    y = y.astype(jnp.float32)
    t = x * y
    # Numerically stable BCEWithLogits (matches PyTorch):
    #   max(x, 0) - x*y + log1p(exp(-|x|))
    bce = jnp.maximum(x, 0.0) - t + jnp.log1p(jnp.exp(-jnp.abs(x)))
    # Hinge: max(1 - (2y-1)*x, 0) == max(1 + x - 2*x*y, 0)  (reuses t)
    hinge = jnp.maximum(1.0 + x - 2.0 * t, 0.0)
    if fold_equal:
        return bce + hinge
    return jnp.float32(weight_bce) * bce + jnp.float32(weight_hinge) * hinge


def _combined_loss_kernel(x_ref, y_ref, o_ref, acc_ref, *,
                          valid_rows_last, needs_mask, weight_bce,
                          weight_hinge, fold_equal, final_scale):
    """Grid axis 0 is the (arbitrary) reduction over row-tiles.

    acc_ref: VMEM f32[8, 128] running lane-parallel partial sum.
    o_ref:   VMEM f32[1, 1] weighted SUM over the main slab (wrapper divides
             by N and adds the ragged tail).
    """
    i = pl.program_id(0)
    last = pl.num_programs(0) - 1

    @pl.when(i == 0)
    def _():
        acc_ref[...] = jnp.zeros_like(acc_ref)

    def accumulate(contrib):
        # Tree-reduce the (tm, 128) contribution to one (8, 128) vreg-group in
        # registers; only 1 vld + 1 vst of the accumulator per grid step.
        acc_ref[...] += contrib.reshape(-1, 8, LANES).sum(axis=0)

    if needs_mask:
        # Steady-state tiles: no masking work at all.
        @pl.when(i < last)
        def _():
            accumulate(_elementwise_loss(x_ref[...], y_ref[...],
                                         weight_bce, weight_hinge, fold_equal))

        # Last tile: only whole rows can be invalid -> row-only compare.
        @pl.when(i == last)
        def _():
            tm = x_ref.shape[0]
            row = jax.lax.broadcasted_iota(jnp.int32, (tm, LANES), 0)
            valid = row < valid_rows_last
            # Mask inputs BEFORE exp/log1p: edge-block garbage may be inf/NaN.
            x = jnp.where(valid, x_ref[...].astype(jnp.float32), 0.0)
            y = jnp.where(valid, y_ref[...].astype(jnp.float32), 0.0)
            contrib = _elementwise_loss(x, y, weight_bce, weight_hinge,
                                        fold_equal)
            accumulate(jnp.where(valid, contrib, 0.0))
    else:
        accumulate(_elementwise_loss(x_ref[...], y_ref[...],
                                     weight_bce, weight_hinge, fold_equal))

    @pl.when(i == last)
    def _():
        total = jnp.sum(acc_ref[...]) * jnp.float32(final_scale)
        o_ref[...] = jnp.reshape(total, (1, 1))


def combined_loss(outputs, labels, weight_bce=0.5, tm_max=TM_MAX):
    """JAX wrapper: copy-free lane-dense slab, in-kernel streaming reduction.

    The kernel covers the largest prefix that is a multiple of
    (granule * 128) elements; the small ragged tail is handled in plain JAX.
    """
    weight_hinge = 1.0 - weight_bce
    fold_equal = abs(float(weight_bce) - float(weight_hinge)) < 1e-12
    n_valid = outputs.size
    assert labels.size == n_valid, "outputs/labels must have the same size"

    x = outputs.reshape(-1)
    y = labels.reshape(-1)

    granule = max(_sublane_granule(x.dtype), _sublane_granule(y.dtype))
    chunk = granule * LANES
    n_main = (n_valid // chunk) * chunk

    total = jnp.float32(0.0)

    if n_main:
        xm = x if n_main == n_valid else x[:n_main]
        ym = y if n_main == n_valid else y[:n_main]
        rows = n_main // LANES
        tm_cap = max(granule, (int(tm_max) // granule) * granule)
        tm = min(rows, tm_cap)
        n_tiles = pl.cdiv(rows, tm)
        valid_rows_last = rows - (n_tiles - 1) * tm   # static Python int
        needs_mask = valid_rows_last != tm

        kernel = functools.partial(
            _combined_loss_kernel,
            valid_rows_last=valid_rows_last,
            needs_mask=needs_mask,
            weight_bce=float(weight_bce),
            weight_hinge=float(weight_hinge),
            fold_equal=fold_equal,
            final_scale=float(weight_bce) if fold_equal else 1.0,
        )

        out = pl.pallas_call(
            kernel,
            out_shape=jax.ShapeDtypeStruct((1, 1), jnp.float32),
            grid_spec=pltpu.PrefetchScalarGridSpec(
                num_scalar_prefetch=0,
                grid=(n_tiles,),
                in_specs=[
                    pl.BlockSpec((tm, LANES), lambda i: (i, 0)),
                    pl.BlockSpec((tm, LANES), lambda i: (i, 0)),
                ],
                out_specs=pl.BlockSpec((1, 1), lambda i: (0, 0)),
                scratch_shapes=[pltpu.VMEM((8, LANES), jnp.float32)],
            ),
            compiler_params=pltpu.CompilerParams(
                dimension_semantics=("arbitrary",)),
        )(xm.reshape(rows, LANES), ym.reshape(rows, LANES))
        total = out[0, 0]

    if n_main != n_valid:
        # Ragged tail (< granule*128 elements): plain JAX, negligible cost,
        # avoids padding/copying the full inputs through HBM.
        xt = x[n_main:]
        yt = y[n_main:]
        total = total + jnp.sum(
            _elementwise_loss(xt, yt, weight_bce, weight_hinge, False))

    return total / jnp.float32(n_valid)


def _reference_combined_loss(outputs, labels, weight_bce=0.5):
    """Pure-JAX reference matching PyTorch CombinedLoss semantics."""
    x = outputs.astype(jnp.float32)
    y = labels.astype(jnp.float32)
    bce = jnp.mean(jnp.maximum(x, 0.0) - x * y + jnp.log1p(jnp.exp(-jnp.abs(x))))
    hinge = jnp.mean(jnp.maximum(1.0 - (2.0 * y - 1.0) * x, 0.0))
    return weight_bce * bce + (1.0 - weight_bce) * hinge


if __name__ == "__main__":
    key = jax.random.PRNGKey(0)
    k1, k2 = jax.random.split(key)

    # Primary test: small NCHW logits / binary labels (single tile, no mask).
    shape = (2, 4, 16, 16)
    outputs = jax.random.normal(k1, shape, dtype=jnp.float32)
    labels = jax.random.bernoulli(k2, 0.5, shape).astype(jnp.float32)
    loss = combined_loss(outputs, labels, weight_bce=0.5)
    jax.block_until_ready(loss)
    ref = _reference_combined_loss(outputs, labels, weight_bce=0.5)
    assert jnp.allclose(loss, ref, rtol=1e-4, atol=1e-5), (loss, ref)

    # Multi-tile grid with a masked partial last tile (small tm_max keeps the
    # test shape small while exercising the steady-state + mask paths).
    shape2 = (4, 8, 96, 96)   # 294912 elems -> 2304 rows -> 5 tiles of 512
    o2 = jax.random.normal(k1, shape2, dtype=jnp.float32)
    l2 = jax.random.bernoulli(k2, 0.5, shape2).astype(jnp.float32)
    loss2 = combined_loss(o2, l2, weight_bce=0.5, tm_max=512)
    jax.block_until_ready(loss2)
    ref2 = _reference_combined_loss(o2, l2, weight_bce=0.5)
    assert jnp.allclose(loss2, ref2, rtol=1e-4, atol=1e-5), (loss2, ref2)

    # Ragged element count (kernel prefix + plain-JAX tail) + unequal weights.
    shape3 = (3, 5, 7, 11)    # 1155 elems -> 1024 in-kernel + 131-element tail
    o3 = jax.random.normal(k1, shape3, dtype=jnp.float32)
    l3 = jax.random.bernoulli(k2, 0.5, shape3).astype(jnp.float32)
    loss3 = combined_loss(o3, l3, weight_bce=0.3)
    jax.block_until_ready(loss3)
    ref3 = _reference_combined_loss(o3, l3, weight_bce=0.3)
    assert jnp.allclose(loss3, ref3, rtol=1e-4, atol=1e-5), (loss3, ref3)

    print("KERNEL_OK")
</pallas_src>

<mosaic_0001>
module attributes {stable_mosaic.version = 11 : i64} {
  func.func @_combined_loss_kernel(%arg0: i32, %arg1: memref<16x128xf32, #tpu.memory_space<vmem>>, %arg2: memref<16x128xf32, #tpu.memory_space<vmem>>, %arg3: memref<1x1xf32, #tpu.memory_space<vmem>>, %arg4: memref<8x128xf32, #tpu.memory_space<vmem>>) attributes {dimension_semantics = [#tpu.dimension_semantics<arbitrary>], iteration_bounds = array<i64: 1>, scalar_prefetch = 0 : i64, scratch_operands = 1 : i64, tpu.core_type = #tpu.core_type<tc>, window_params = [{transform_indices = @transform_0, window_bounds = array<i64: 16, 128>}, {transform_indices = @transform_1, window_bounds = array<i64: 16, 128>}, {pipeline_mode = #tpu.pipeline_mode<synchronous>, transform_indices = @transform_2, window_bounds = array<i64: 1, 1>}]} {
    %c0_i32 = arith.constant 0 : i32
    %0 = arith.cmpi eq, %arg0, %c0_i32 : i32
    %1 = arith.extui %0 : i1 to i32
    %c0_i32_0 = arith.constant 0 : i32
    %2 = arith.cmpi ne, %1, %c0_i32_0 : i32
    scf.if %2 {
      %cst_15 = arith.constant 0.000000e+00 : f32
      %31 = vector.broadcast %cst_15 : f32 to vector<8x128xf32>
      %c0_16 = arith.constant 0 : index
      %c0_17 = arith.constant 0 : index
      %32 = vector.load %arg4[%c0_16, %c0_17] : memref<8x128xf32, #tpu.memory_space<vmem>>, vector<8x128xf32>
      tpu.vector_store %arg4[%c0_16, %c0_17], %31 {strides = array<i32>} : memref<8x128xf32, #tpu.memory_space<vmem>>, vector<8x128xf32>,
    } else {
    }
    %c0 = arith.constant 0 : index
    %c0_1 = arith.constant 0 : index
    %3 = vector.load %arg1[%c0, %c0_1] : memref<16x128xf32, #tpu.memory_space<vmem>>, vector<16x128xf32>
    %c0_2 = arith.constant 0 : index
    %c0_3 = arith.constant 0 : index
    %4 = vector.load %arg2[%c0_2, %c0_3] : memref<16x128xf32, #tpu.memory_space<vmem>>, vector<16x128xf32>
    %5 = arith.mulf %3, %4 : vector<16x128xf32>
    %cst = arith.constant 0.000000e+00 : f32
    %6 = vector.broadcast %cst : f32 to vector<16x128xf32>
    %7 = arith.maximumf %3, %6 : vector<16x128xf32>
    %8 = arith.subf %7, %5 : vector<16x128xf32>
    %9 = math.absf %3 : vector<16x128xf32>
    %cst_4 = arith.constant 0.000000e+00 : f32
    %10 = vector.broadcast %cst_4 : f32 to vector<16x128xf32>
    %11 = arith.subf %10, %9 : vector<16x128xf32>
    %12 = math.exp %11 : vector<16x128xf32>
    %13 = math.log1p %12 : vector<16x128xf32>
    %14 = arith.addf %8, %13 : vector<16x128xf32>
    %cst_5 = arith.constant 1.000000e+00 : f32
    %15 = vector.broadcast %cst_5 : f32 to vector<16x128xf32>
    %16 = arith.addf %15, %3 : vector<16x128xf32>
    %cst_6 = arith.constant 2.000000e+00 : f32
    %17 = vector.broadcast %cst_6 : f32 to vector<16x128xf32>
    %18 = arith.mulf %17, %5 : vector<16x128xf32>
    %19 = arith.subf %16, %18 : vector<16x128xf32>
    %cst_7 = arith.constant 0.000000e+00 : f32
    %20 = vector.broadcast %cst_7 : f32 to vector<16x128xf32>
    %21 = arith.maximumf %19, %20 : vector<16x128xf32>
    %22 = arith.addf %14, %21 : vector<16x128xf32>
    %c0_8 = arith.constant 0 : index
    %c0_9 = arith.constant 0 : index
    %23 = vector.load %arg4[%c0_8, %c0_9] : memref<8x128xf32, #tpu.memory_space<vmem>>, vector<8x128xf32>
    %24 = vector.shape_cast %22 : vector<16x128xf32> to vector<2x8x128xf32>
    %cst_10 = arith.constant dense<0.000000e+00> : vector<8x128xf32>
    %25 = vector.multi_reduction <add>, %24, %cst_10 [0] : vector<2x8x128xf32> to vector<8x128xf32>
    %26 = arith.addf %23, %25 : vector<8x128xf32>
    %c0_11 = arith.constant 0 : index
    %c0_12 = arith.constant 0 : index
    %27 = vector.load %arg4[%c0_11, %c0_12] : memref<8x128xf32, #tpu.memory_space<vmem>>, vector<8x128xf32>
    tpu.vector_store %arg4[%c0_11, %c0_12], %26 {strides = array<i32>} : memref<8x128xf32, #tpu.memory_space<vmem>>, vector<8x128xf32>,
    %c0_i32_13 = arith.constant 0 : i32
    %28 = arith.cmpi eq, %arg0, %c0_i32_13 : i32
    %29 = arith.extui %28 : i1 to i32
    %c0_i32_14 = arith.constant 0 : i32
    %30 = arith.cmpi ne, %29, %c0_i32_14 : i32
    scf.if %30 {
      %c0_15 = arith.constant 0 : index
      %c0_16 = arith.constant 0 : index
      %31 = vector.load %arg4[%c0_15, %c0_16] : memref<8x128xf32, #tpu.memory_space<vmem>>, vector<8x128xf32>
      %32 = vector.shape_cast %31 : vector<8x128xf32> to vector<1x8x128xf32>
      %cst_17 = arith.constant dense<0.000000e+00> : vector<1xf32>
      %33 = vector.multi_reduction <add>, %32, %cst_17 [1, 2] : vector<1x8x128xf32> to vector<1xf32>
      %34 = vector.shape_cast %33 : vector<1xf32> to vector<1x1x1xf32>
      %35 = vector.extract %34[0, 0, 0] : f32 from vector<1x1x1xf32>
      %cst_18 = arith.constant 5.000000e-01 : f32
      %36 = arith.mulf %35, %cst_18 : f32
      %37 = vector.broadcast %36 : f32 to vector<1x1xf32>
      %c0_19 = arith.constant 0 : index
      %c0_20 = arith.constant 0 : index
      %38 = vector.load %arg3[%c0_19, %c0_20] : memref<1x1xf32, #tpu.memory_space<vmem>>, vector<1x1xf32>
      tpu.vector_store %arg3[%c0_19, %c0_20], %37 {strides = array<i32>} : memref<1x1xf32, #tpu.memory_space<vmem>>, vector<1x1xf32>,
    } else {
    }
    return
  }
  func.func @transform_0(%arg0: i32) -> (i32, i32) {
    %c0_i32 = arith.constant 0 : i32
    %c0_i32_0 = arith.constant 0 : i32
    return %arg0, %c0_i32 : i32, i32
  }
  func.func @transform_1(%arg0: i32) -> (i32, i32) {
    %c0_i32 = arith.constant 0 : i32
    %c0_i32_0 = arith.constant 0 : i32
    return %arg0, %c0_i32 : i32, i32
  }
  func.func @transform_2(%arg0: i32) -> (i32, i32) {
    %c0_i32 = arith.constant 0 : i32
    %c0_i32_0 = arith.constant 0 : i32
    %c0_i32_1 = arith.constant 0 : i32
    return %c0_i32, %c0_i32_0 : i32, i32
  }
}

</mosaic_0001>

<bundles_post_ra>
// kernel: tpu_custom_call.1
= control target key start
LH: loop header
LB: loop body
LE: loop exit
PB: predicated region body
PF: predicated region fallthrough
CT: control target
= control target key end

     0   :  { %7 = vsyncpa [#allocation4], 0  ;;  %s273_s0 = inlined_call_operand.hbm [shape: f32[16,128], index: 0, kind: input, shape index: {}]   ;;  %s274_s1 = inlined_call_operand.hbm [shape: f32[16,128], index: 1, kind: input, shape index: {}]   ;;  %s275_s2 = inlined_call_operand.hbm [shape: f32[1,1], index: 2, kind: output, shape index: {}]  }
   0x1   :  { %8 = vsyncpa [#allocation7], 0 }
   0x2   :  { %9 = vsyncpa [#allocation5], 0  ;;  %s217_s9 = smov [#allocation3]   ;;  %s145_s13 = scalar_lea.hbm %s273_s0, 256 }
   0x3   :  { %s15_s10 = sshll.u32 %s217_s9, 4  ;;  %p146_p0 = scmp.ne.s32.totalorder %s273_s0, %s145_s13  ;;  %s16_s10 = int_to_ptr.vmem [resolvable:$true] %s15_s10 }
   0x4   :  { %p149_p1 = scmp.lt.u32.totalorder %s145_s13, %s273_s0 }
   0x6   :  { %p151_p2 = pnand %p149_p1, %p146_p0 }
   0x8   :  { %154 = shalt.err (!%p151_p2)
}
   0x9   :  { %s155_s18 = scalar_lea.vmem %s16_s10, 256  ;;  %p160_p4 = scmp.lt.s32.totalorder %s16_s10, %s16_s10 }
   0xa   :  { %p156_p3 = scmp.ne.s32.totalorder %s16_s10, %s155_s18  ;;  %p161_p5 = scmp.lt.s32.totalorder %s155_s18, %s155_s18 }
   0xc   :  { %p162_p6 = por %p161_p5, %p160_p4 }
   0xe   :  { %p163_p7 = pnand %p162_p6, %p156_p3 }
  0x10   :  { %166 = shalt.err (!%p163_p7)
}
  0x11   :  { %s218_s19 = smov 128   ;;  %s219_s20 = smov 8  }
  0x12   :  { %21 = dma.hbm_to_vmem [thread:$0]  %s273_s0, 256, %s16_s10, [#allocation4], %s218_s19, %s218_s19, %s219_s20  }
  0x13   :  { %s220_s23 = smov [#allocation6]   ;;  %s167_s27 = scalar_lea.hbm %s274_s1, 256 }
  0x14   :  { %s27_s24 = sshll.u32 %s220_s23, 4  ;;  %p168_p8 = scmp.ne.s32.totalorder %s274_s1, %s167_s27  ;;  %s28_s24 = int_to_ptr.vmem [resolvable:$true] %s27_s24 }
  0x15   :  { %p171_p9 = scmp.lt.u32.totalorder %s167_s27, %s274_s1 }
  0x17   :  { %p173_p10 = pnand %p171_p9, %p168_p8 }
  0x19   :  { %176 = shalt.err (!%p173_p10)
}
  0x1a   :  { %s177_s4 = scalar_lea.vmem %s28_s24, 256  ;;  %p182_p12 = scmp.lt.s32.totalorder %s28_s24, %s28_s24 }
  0x1b   :  { %p178_p11 = scmp.ne.s32.totalorder %s28_s24, %s177_s4  ;;  %p183_p13 = scmp.lt.s32.totalorder %s177_s4, %s177_s4 }
  0x1d   :  { %p184_p0 = por %p183_p13, %p182_p12 }
  0x1f   :  { %p185_p1 = pnand %p184_p0, %p178_p11 }
  0x21   :  { %188 = shalt.err (!%p185_p1)
}
  0x22   :  { %33 = dma.hbm_to_vmem [thread:$0]  %s274_s1, 256, %s28_s24, [#allocation7], %s218_s19, %s218_s19, %s219_s20  }
  0x23   :  { %211 = dma.done.wait [#allocation4], 256  }
  0x24   :  { %212 = vsyncadd [#allocation4], 4294967040 }
  0x25   :  { %213 = dma.done.wait [#allocation7], 256  }
  0x26   :  { %214 = vsyncadd [#allocation7], 4294967040  ;;  %v45_v0 = vld [vmem:[#allocation3] sm:$0xff]  ;;  %v46_v1 = vld [vmem:[#allocation3 + $0x8] sm:$0xff]  ;;  %s221_s1 = smov [#allocation8]   ;;  %vm112_vm2 = vcmask 0  }
  0x27   :  { %v55_v2 = vand.u32 2147483647, %v45_v0  ;;  %v56_v3 = vand.u32 2147483647, %v46_v1  ;;  %v47_v9 = vld [vmem:[#allocation6] sm:$0xff]  ;;  %v48_v11 = vld [vmem:[#allocation6 + $0x8] sm:$0xff] }
  0x28   :  { %v49_v14 = vmul.f32 %v47_v9, %v45_v0  ;;  %v50_v15 = vmul.f32 %v48_v11, %v46_v1  ;;  %v83_v18 = vadd.f32 1.0, %v45_v0  ;;  %v84_v21 = vadd.f32 1.0, %v46_v1  ;;  %s120_s6 = sshll.u32 %s221_s1, 4  ;;  %s121_s6 = int_to_ptr.vmem [resolvable:$true] %s120_s6 }
  0x29   :  { %v57_v4 = vsub.f32 0.0, %v55_v2  ;;  %v58_v5 = vsub.f32 0.0, %v56_v3  ;;  %v51_v23 = vmax.f32 %v45_v0, 0.0  ;;  %v52_v26 = vmax.f32 %v46_v1, 0.0  ;;  %s189_s9 = scalar_lea.vmem %s121_s6, 16  ;;  %s193_s10 = scalar_lea.vmem %s121_s6, 32 }
  0x2a   :  { %v85_v19 = vmul.f32 2.0, %v49_v14  ;;  %v86_v22 = vmul.f32 2.0, %v50_v15  ;;  %p190_p2 = scmp.ne.s32.totalorder %s121_s6, %s189_s9  ;;  %p194_p3 = scmp.lt.s32.totalorder %s121_s6, %s121_s6 }
  0x2b   :  { %v59_v6 = vmul.f32 1.442695, %v57_v4  ;;  %v61_v7 = vmul.f32 1.442695, %v58_v5  ;;  %v53_v32 = vsub.f32 %v51_v23, %v49_v14  ;;  %v54_v35 = vsub.f32 %v52_v26, %v50_v15  ;;  %p195_p4 = scmp.lt.s32.totalorder %s193_s10, %s189_s9 }
  0x2c   :  { %v87_v28 = vsub.f32 %v83_v18, %v85_v19  ;;  %v88_v30 = vsub.f32 %v84_v21, %v86_v22 }
  0x2d   :  { %137 = vpow2.f32 %v59_v6  ;;  %p196_p5 = por %p195_p4, %p194_p3 }
  0x2e   :  { %139 = vpow2.f32 %v61_v7  ;;  %v89_v38 = vmax.f32 %v87_v28, 0.0  ;;  %v90_v40 = vmax.f32 %v88_v30, 0.0 }
  0x2f   :  { %p197_p6 = pnand %p196_p5, %p190_p2 }
  0x37   :  { %v138_v8 = vpop.eup %137 }
  0x38   :  { %v140_v10 = vpop.eup %139  ;;  %v63_v12 = vadd.f32 1.0, %v138_v8  ;;  %v66_v16 = vmul.f32 -0.5, %v138_v8  ;;  %v69_v24 = vand.u32 2147483647, %v138_v8 }
  0x39   :  { %v72_v13 = vadd.f32 1.0, %v140_v10  ;;  %v75_v17 = vmul.f32 -0.5, %v140_v10  ;;  %v78_v27 = vand.u32 2147483647, %v140_v10 }
  0x3a   :  { %141 = vlog2.f32 %v63_v12  ;;  %v67_v20 = vadd.f32 1.0, %v66_v16  ;;  %vm70_vm0 = vcmp.lt.f32.partialorder %v69_v24, 0.0004427343 }
  0x3b   :  { %143 = vlog2.f32 %v72_v13  ;;  %v76_v25 = vadd.f32 1.0, %v75_v17  ;;  %vm79_vm1 = vcmp.lt.f32.partialorder %v78_v27, 0.0004427343 }
  0x3c   :  { %v68_v29 = vmul.f32 %v138_v8, %v67_v20 }
  0x3d   :  { %v77_v33 = vmul.f32 %v140_v10, %v76_v25 }
  0x44   :  { %v142_v31 = vpop.eup %141 }
  0x45   :  { %v144_v34 = vpop.eup %143  ;;  %v65_v36 = vmul.f32 0.6931472, %v142_v31 }
  0x46   :  { %v74_v37 = vmul.f32 0.6931472, %v144_v34 }
  0x47   :  { %v71_v39 = vsel %vm70_vm0, %v68_v29, %v65_v36 }
  0x48   :  { %v80_v41 = vsel %vm79_vm1, %v77_v33, %v74_v37  ;;  %v81_v42 = vadd.f32 %v71_v39, %v53_v32 }
  0x49   :  { %v82_v43 = vadd.f32 %v80_v41, %v54_v35 }
  0x4a   :  { %v91_v44 = vadd.f32 %v89_v38, %v81_v42 }
  0x4b   :  { %v92_v45 = vadd.f32 %v90_v40, %v82_v43 }
  0x4d   :  { %v94_v46 = vadd.f32 %v92_v45, %v91_v44 }
  0x4f   :  { %101 = vadd.xlane.f32.xlu0 %v94_v46 }
  0xdc   :  { %v102_v47 = vpop.xlane.xlu0 %101 }
  0xdd   :  { %v103_v48 = vrot.slane %v102_v47, 4 }
  0xdf   :  { %v104_v49 = vadd.f32 %v103_v48, %v102_v47 }
  0xe1   :  { %v105_v50 = vrot.slane %v104_v49, 2 }
  0xe3   :  { %v106_v51 = vadd.f32 %v105_v50, %v104_v49 }
  0xe5   :  { %v107_v52 = vrot.slane %v106_v51, 1 }
  0xe7   :  { %v108_v53 = vadd.f32 %v107_v52, %v106_v51 }
  0xe9   :  { %130 = vpush %v108_v53 }
 0x11a   :  { %s131_s7 = spop %130 }
 0x11b   :  { %s110_s8 = smul.f32 0.5, %s131_s7 }
 0x11d   :  { %v111_v54 = vstv %s110_s8 }
 0x11e   :  { %113 = vst.msk [vmem:[#allocation8] sm:$0x1] %vm112_vm2, %v111_v54 }
 0x11f   :  { %200 = shalt.err (!%p197_p6)
}
 0x120   :  { %s201_s13 = scalar_lea.hbm %s275_s2, 16 }
 0x121   :  { %p202_p7 = scmp.ne.s32.totalorder %s275_s2, %s201_s13  ;;  %p205_p8 = scmp.lt.u32.totalorder %s201_s13, %s275_s2 }
 0x123   :  { %p207_p9 = pnand %p205_p8, %p202_p7 }
 0x125   :  { %210 = shalt.err (!%p207_p9)
}
 0x126   :  { %123 = dma.vmem_to_hbm [thread:$0]  %s121_s6, 16, %s275_s2, [#allocation5]  }
 0x127   :  { %215 = dma.done.wait [#allocation5], 16  }
 0x128   :  { %216 = vsyncadd [#allocation5], 4294967280 }
 0x129   :  { %127 = vsyncpa [#allocation4], 1 }
 0x12a   :  { %128 = vsyncpa [#allocation7], 1 }
 0x12b   :  { %129 = vsyncpa [#allocation5], 1 }

</bundles_post_ra>
